<compile_context>
chip_gen: v6e
topology: v6e:2x2x1
jax: 0.10.0
libtpu: 0.0.40
codegen_flags: <defaults>
</compile_context>

<pallas_src>
import jax
import jax.numpy as jnp
from jax.experimental import pallas as pl
from jax.experimental.pallas import tpu as pltpu


def edge_weight_kernel(x_ref, w1_ref, b1_ref, w2_ref, b2_ref, o_ref):
    # x_ref:  (10, TILE) f32, batch on lanes
    # w1_ref: (10, 10)   fc1.weight in PyTorch (out, in) layout
    # b1_ref: (10, 1)    fc1.bias as a column
    # w2_ref: (1, 10)    fc2.weight as a row
    # b2_ref: (1, 1)     fc2.bias, SMEM scalar
    # o_ref:  (1, TILE)  lane-dense output row
    x = x_ref[...]
    # fc1 (transposed math): h[o, n] = sum_i W1[o, i] * x[i, n] + b1[o]
    h = jnp.dot(w1_ref[...], x, preferred_element_type=jnp.float32) + b1_ref[...]
    # ELU(alpha=1): h if h > 0 else exp(h) - 1.  min() keeps exp() finite on the
    # positive branch (benign either way: it is a select, not arithmetic).
    # TODO(synk): jnp.expm1 would shave ~1e-7 of cancellation just below 0;
    # kept on exp() to stay on guaranteed Mosaic lowerings (matches torch to
    # ~1e-7, well inside tolerance).
    a = jnp.where(h > 0, h, jnp.exp(jnp.minimum(h, 0.0)) - 1.0)
    # fc2 as a second tiny MXU matmul (M=1, K=10): stays off the VPU/XLU so it
    # hides under DMA even on v7x's much fatter HBM pipe.
    o_ref[...] = (
        jnp.dot(w2_ref[...], a, preferred_element_type=jnp.float32) + b2_ref[0, 0]
    )


def edge_weight_layer(x, w1, b1, w2, b2, *, max_tile=65536):
    """x: (N, 10) float32.  Returns (N,) float32 == fc2(ELU(fc1(x))).squeeze(1)."""
    N, F = x.shape
    assert F == 10

    # --- tiling policy ------------------------------------------------------
    # Pad the batch to a multiple of 128 lanes only (never to a full tile).
    n128 = pl.cdiv(N, 128) * 128
    # Grid steps: enough that no step exceeds max_tile lanes, and >= 2 whenever
    # the batch allows it so v7x's two TensorCores both get a "parallel" step
    # (a no-op for single-TC v5e/v6e).
    g = pl.cdiv(n128, max_tile)
    if n128 >= 256:
        g = max(g, 2)
    # Even split, rounded up to 128 lanes; total dead work is < g*128 lanes,
    # never a full dead tile for unlucky N.
    tile = pl.cdiv(n128 // 128, g) * 128
    n_pad = g * tile

    # Batch-on-lanes: pad first so the (tiny) pad fuses into the single
    # transpose copy under jit -> one extra HBM pass over x, after which the
    # kernel streams dense 128-wide lanes and does unmasked lane-dense stores.
    x_t = jnp.pad(x, ((0, n_pad - N), (0, 0))).T  # (10, n_pad)

    # VMEM: x double-buffer (10 -> 16 sublanes) + out double-buffer + slack for
    # the resident weight blocks / semaphores.  Capped well under v7x's 64 MiB
    # physical VMEM; explicit so v5e's 16 MiB scoped default is never a limit.
    vmem_bytes = 2 * 16 * tile * 4 + 2 * 8 * tile * 4 + (2 << 20)

    out = pl.pallas_call(
        edge_weight_kernel,
        out_shape=jax.ShapeDtypeStruct((1, n_pad), jnp.float32),
        grid=(g,),
        in_specs=[
            pl.BlockSpec((10, tile), lambda i: (0, i)),          # x_t (pipelined)
            pl.BlockSpec((10, 10), lambda i: (0, 0)),            # w1  (resident)
            pl.BlockSpec((10, 1), lambda i: (0, 0)),             # b1  (resident)
            pl.BlockSpec((1, 10), lambda i: (0, 0)),             # w2  (resident)
            pl.BlockSpec(memory_space=pltpu.MemorySpace.SMEM),   # b2  (scalar)
        ],
        out_specs=pl.BlockSpec((1, tile), lambda i: (0, i)),
        compiler_params=pltpu.CompilerParams(
            dimension_semantics=("parallel",),
            vmem_limit_bytes=min(vmem_bytes, 48 * 1024 * 1024),
        ),
    )(x_t, w1, b1, w2, b2)
    return out[0, :N]


def init_params():
    # fc1.weight = eye(10) (PyTorch (out, in) layout; used directly since the
    # kernel computes the transposed math h_t = W1 @ x_t).
    w1 = jnp.eye(10, dtype=jnp.float32)
    # fc1.bias: PyTorch default uniform(-1/sqrt(10), 1/sqrt(10)), made
    # deterministic via PRNGKey(0).  Stored as a (10, 1) column.
    bound = 1.0 / jnp.sqrt(10.0)
    b1 = jax.random.uniform(jax.random.PRNGKey(0), (10, 1), jnp.float32,
                            -bound, bound)
    # fc2.weight copied from init_w, kept as a (1, 10) row (fed straight to MXU).
    w2 = jnp.array(
        [[1.0, 0.7, 0.5, 0.3, -0.5, -0.8, -0.3, -0.5, 0.2, -0.2]],
        dtype=jnp.float32)
    # fc2.bias zero-initialized (SMEM scalar).
    b2 = jnp.zeros((1, 1), dtype=jnp.float32)
    return w1, b1, w2, b2


if __name__ == "__main__":
    key = jax.random.PRNGKey(0)
    N = 300  # not a multiple of 128 -> exercises lane padding and a 2-step grid
    x = jax.random.normal(jax.random.fold_in(key, 1), (N, 10), jnp.float32)

    w1, b1, w2, b2 = init_params()

    fwd = jax.jit(edge_weight_layer, static_argnames=("max_tile",))
    out = jax.block_until_ready(fwd(x, w1, b1, w2, b2))

    # Plain-JAX reference mirroring the PyTorch module.
    h_ref = x @ w1.T + b1[:, 0]
    a_ref = jnp.where(h_ref > 0, h_ref, jnp.exp(h_ref) - 1.0)
    ref = a_ref @ w2[0] + b2[0, 0]

    assert out.shape == (N,)
    assert jnp.allclose(out, ref, atol=1e-5), (out, ref)

    print("KERNEL_OK")
</pallas_src>

<mosaic_0001>
module attributes {stable_mosaic.version = 11 : i64} {
  func.func @edge_weight_kernel(%arg0: i32, %arg1: memref<10x256xf32, #tpu.memory_space<vmem>>, %arg2: memref<10x10xf32, #tpu.memory_space<vmem>>, %arg3: memref<10x1xf32, #tpu.memory_space<vmem>>, %arg4: memref<1x10xf32, #tpu.memory_space<vmem>>, %arg5: memref<1x1xf32, #tpu.memory_space<smem>>, %arg6: memref<1x256xf32, #tpu.memory_space<vmem>>) attributes {dimension_semantics = [#tpu.dimension_semantics<parallel>], iteration_bounds = array<i64: 2>, scalar_prefetch = 0 : i64, scratch_operands = 0 : i64, tpu.core_type = #tpu.core_type<tc>, window_params = [{transform_indices = @transform_0, window_bounds = array<i64: 10, 256>}, {pipeline_mode = #tpu.pipeline_mode<synchronous>, transform_indices = @transform_1, window_bounds = array<i64: 10, 10>}, {pipeline_mode = #tpu.pipeline_mode<synchronous>, transform_indices = @transform_2, window_bounds = array<i64: 10, 1>}, {pipeline_mode = #tpu.pipeline_mode<synchronous>, transform_indices = @transform_3, window_bounds = array<i64: 1, 10>}, {transform_indices = @transform_4, window_bounds = array<i64: 1, 1>}, {transform_indices = @transform_5, window_bounds = array<i64: 1, 256>}]} {
    %c0 = arith.constant 0 : index
    %c0_0 = arith.constant 0 : index
    %0 = vector.load %arg1[%c0, %c0_0] : memref<10x256xf32, #tpu.memory_space<vmem>>, vector<10x256xf32>
    %c0_1 = arith.constant 0 : index
    %c0_2 = arith.constant 0 : index
    %1 = vector.load %arg2[%c0_1, %c0_2] : memref<10x10xf32, #tpu.memory_space<vmem>>, vector<10x10xf32>
    %cst = arith.constant dense<0.000000e+00> : vector<10x256xf32>
    %2 = tpu.matmul %1, %0, %cst {dimension_numbers = #tpu.dot_dimension_numbers<[1], [0], [0], [1], [0, 0, 1, 1], [], []>} : vector<10x10xf32>, vector<10x256xf32>, vector<10x256xf32> -> vector<10x256xf32>
    %c0_3 = arith.constant 0 : index
    %c0_4 = arith.constant 0 : index
    %3 = vector.load %arg3[%c0_3, %c0_4] : memref<10x1xf32, #tpu.memory_space<vmem>>, vector<10x1xf32>
    %4 = vector.broadcast %3 : vector<10x1xf32> to vector<10x256xf32>
    %5 = arith.addf %2, %4 : vector<10x256xf32>
    %cst_5 = arith.constant 0.000000e+00 : f32
    %6 = vector.broadcast %cst_5 : f32 to vector<10x256xf32>
    %7 = arith.cmpf ogt, %5, %6 : vector<10x256xf32>
    %cst_6 = arith.constant 0.000000e+00 : f32
    %8 = vector.broadcast %cst_6 : f32 to vector<10x256xf32>
    %9 = arith.minimumf %5, %8 : vector<10x256xf32>
    %10 = math.exp %9 : vector<10x256xf32>
    %cst_7 = arith.constant 1.000000e+00 : f32
    %11 = vector.broadcast %cst_7 : f32 to vector<10x256xf32>
    %12 = arith.subf %10, %11 : vector<10x256xf32>
    %13 = arith.select %7, %5, %12 : vector<10x256xi1>, vector<10x256xf32>
    %c0_8 = arith.constant 0 : index
    %c0_9 = arith.constant 0 : index
    %14 = vector.load %arg4[%c0_8, %c0_9] : memref<1x10xf32, #tpu.memory_space<vmem>>, vector<1x10xf32>
    %cst_10 = arith.constant dense<0.000000e+00> : vector<1x256xf32>
    %15 = tpu.matmul %14, %13, %cst_10 {dimension_numbers = #tpu.dot_dimension_numbers<[1], [0], [0], [1], [0, 0, 1, 1], [], []>} : vector<1x10xf32>, vector<10x256xf32>, vector<1x256xf32> -> vector<1x256xf32>
    %c0_11 = arith.constant 0 : index
    %c0_12 = arith.constant 0 : index
    %16 = memref.load %arg5[%c0_11, %c0_12] : memref<1x1xf32, #tpu.memory_space<smem>>
    %17 = vector.broadcast %16 : f32 to vector<1x256xf32>
    %18 = arith.addf %15, %17 : vector<1x256xf32>
    %c0_13 = arith.constant 0 : index
    %c0_14 = arith.constant 0 : index
    %19 = vector.load %arg6[%c0_13, %c0_14] : memref<1x256xf32, #tpu.memory_space<vmem>>, vector<1x256xf32>
    tpu.vector_store %arg6[%c0_13, %c0_14], %18 {strides = array<i32>} : memref<1x256xf32, #tpu.memory_space<vmem>>, vector<1x256xf32>,
    return
  }
  func.func @transform_0(%arg0: i32) -> (i32, i32) {
    %c0_i32 = arith.constant 0 : i32
    %c0_i32_0 = arith.constant 0 : i32
    return %c0_i32, %arg0 : i32, i32
  }
  func.func @transform_1(%arg0: i32) -> (i32, i32) {
    %c0_i32 = arith.constant 0 : i32
    %c0_i32_0 = arith.constant 0 : i32
    %c0_i32_1 = arith.constant 0 : i32
    return %c0_i32, %c0_i32_0 : i32, i32
  }
  func.func @transform_2(%arg0: i32) -> (i32, i32) {
    %c0_i32 = arith.constant 0 : i32
    %c0_i32_0 = arith.constant 0 : i32
    %c0_i32_1 = arith.constant 0 : i32
    return %c0_i32, %c0_i32_0 : i32, i32
  }
  func.func @transform_3(%arg0: i32) -> (i32, i32) {
    %c0_i32 = arith.constant 0 : i32
    %c0_i32_0 = arith.constant 0 : i32
    %c0_i32_1 = arith.constant 0 : i32
    return %c0_i32, %c0_i32_0 : i32, i32
  }
  func.func @transform_4(%arg0: i32) -> (i32, i32) {
    %c0_i32 = arith.constant 0 : i32
    %c0_i32_0 = arith.constant 0 : i32
    %c0_i32_1 = arith.constant 0 : i32
    return %c0_i32, %c0_i32_0 : i32, i32
  }
  func.func @transform_5(%arg0: i32) -> (i32, i32) {
    %c0_i32 = arith.constant 0 : i32
    %c0_i32_0 = arith.constant 0 : i32
    return %c0_i32, %arg0 : i32, i32
  }
}

</mosaic_0001>

<bundles_post_ra>
// kernel: edge_weight_layer.1
= control target key start
LH: loop header
LB: loop body
LE: loop exit
PB: predicated region body
PF: predicated region fallthrough
CT: control target
= control target key end

     0   :  { %s741_s0 = inlined_call_operand.vmem [shape: f32[10,512], index: 0, kind: input, shape index: {}]   ;;  %s742_s1 = inlined_call_operand.vmem [shape: f32[10,10], index: 1, kind: input, shape index: {}]   ;;  %s743_s2 = inlined_call_operand.vmem [shape: f32[10,1], index: 2, kind: input, shape index: {}]   ;;  %s744_s3 = inlined_call_operand.vmem [shape: f32[1,10], index: 3, kind: input, shape index: {}]   ;;  %s745_s4 = inlined_call_operand.<no memory space> [shape: f32[1,1], index: 4, kind: input, shape index: {}]   ;;  %s746_s5 = inlined_call_operand.vmem [shape: f32[1,512], index: 5, kind: output, shape index: {}]  }
   0x1   :  { %10 = sst [smem:[#allocation2]] %s745_s4 }
   0x2   :  { %s667_s20 = smov 0   ;;  %s669_s21 = smov 0  }
   0x3   :  { %s671_s22 = smov 0  }
   0x4 LB: > { %s547_s4 = sadd.s32 4294967295, %s629_s22   ;;  %s684_s23 = sadd.s32 1, %s629_s22   ;;  %s629_s22 = sphi %s671_s22, %s749_s22   ;;  %s625_s21 = sphi %s669_s21, %s748_s21   ;;  %s621_s20 = sphi %s667_s20, %s747_s20  }
   0x5   : > { %s20_s24 = ssub.s32 %s629_s22, %s684_s23  ;;  %s23_s25 = sadd.s32 1, %s625_s21 }
   0x6   : > { %p21_p0 = scmp.eq.s32.totalorder %s20_s24, 0  ;;  %p30_p1 = scmp.ne.s32.totalorder %s625_s21, %s621_s20 }
   0x7   : > { %p31_p2 = scmp.eq.s32.totalorder %s629_s22, 0  ;;  %p550_p4 = scmp.ge.s32.totalorder %s629_s22, 2 }
   0x8   : > { %s693_s26 = scalar_select %p21_p0, %s625_s21, %s23_s25  }
   0x9   : > { %p32_p3 = por %p31_p2, %p30_p1  ;;  %178 = sbr.rel (%p550_p4) target bundleno = 20 (0x14), region = 32 }
   0xe   : > { %181 = sbr.rel (!%p32_p3) target bundleno = 20 (0x14), region = 36  ;;  %s183_s27 = sand.u32 (%p32_p3), 1, %s625_s21  }
   0xf   : > { %s570_s28 = sshll.u32 (%p32_p3), %s629_s22, 4  ;;  %s551_s29 = sshll.u32 (%p32_p3), %s183_s27, 5 }
  0x10   : > { %s188_s7 = scalar_lea.vmem (%p32_p3), %s741_s0, %s570_s28  ;;  %s185_s8 = scalar_lea.vmem (%p32_p3), [#allocation3], %s551_s29 }
  0x11   : > { %v201_v0 = vld [vmem:[%s188_s7] sm:$0xff] (%p32_p3)  ;;  %v203_v1 = vld [vmem:[%s188_s7 + $0x8] sm:$0xff] (%p32_p3) }
  0x12   : > { %v205_v2 = vld [vmem:[%s188_s7 + $0x20] sm:$0xff] (%p32_p3)  ;;  %202 = vst [vmem:[%s185_s8] sm:$0xff] (%p32_p3), %v201_v0  ;;  %204 = vst [vmem:[%s185_s8 + $0x8] sm:$0xff] (%p32_p3), %v203_v1  ;;  %v207_v3 = vld [vmem:[%s188_s7 + $0x28] sm:$0xff] (%p32_p3) }
  0x13   : > { %206 = vst [vmem:[%s185_s8 + $0x10] sm:$0xff] %v205_v2  ;;  %208 = vst [vmem:[%s185_s8 + $0x18] sm:$0xff] %v207_v3 }
  0x14 PF: > { %p554_p5 = scmp.ge.s32.totalorder %s629_s22, 1  ;;  %p213_p6 = scmp.lt.s32.totalorder %s629_s22, 3 }
  0x16   : > { %p214_p7 = pnand %p554_p5, %p213_p6 }
  0x17   : > { %s220_s9 = sand.u32 (!%p214_p7), 1, %s621_s20   ;;  %s386_s25 = sld [smem:[#allocation2]] (!%p214_p7) }
  0x18   : > { %217 = sbr.rel (%p214_p7) target bundleno = 466 (0x1d2), region = 59  ;;  %s555_s10 = sshll.u32 (!%p214_p7), %s220_s9, 5 }
  0x19   : > { %s222_s15 = scalar_lea.vmem (!%p214_p7), [#allocation3], %s555_s10  ;;  %s556_s27 = sshll.u32 (!%p214_p7), %s547_s4, 1 }
  0x1a   : > { %p248_p8 = scmp.lt.s32.totalorder (!%p214_p7), %s556_s27, 3 }
  0x1d   : > { %vm277_vm0 = vcmask 1041408   ;;  %v631_v4 = vmov 0.0   ;;  %v632_v5 = vmov 0   ;;  %v259_v6 = vld [vmem:[%s743_s2 + $0x8] sm:$0x3]  ;;  %v258_v7 = vld [vmem:[%s743_s2] sm:$0xff]  ;;  %v474_v47 = vlaneseq }
  0x1e   : > { %348 = vmatprep.mubr.f32.mxu0 %v631_v4  ;;  %598 = vset.pattern.permute.xlu0 %v632_v5  ;;  %v255_v8 = vld [vmem:[%s222_s15 + $0x18] sm:$0x3]  ;;  %v254_v9 = vld [vmem:[%s222_s15 + $0x10] sm:$0x3]  ;;  %v253_v10 = vld [vmem:[%s222_s15 + $0x8] sm:$0xff]  ;;  %vm270_vm1 = vcmask 80896   ;;  %v387_v50 = vstv %s386_s25 }
  0x1f   : > { %267 = vperm.xlu0 %598, %v259_v6   ;;  %461 = vmatprep.mubr.f32.mxu1 %v631_v4  ;;  %v252_v11 = vld [vmem:[%s222_s15] sm:$0xff]  ;;  %v257_v13 = vld [vmem:[%s742_s1 + $0x8] sm:$0x3]  ;;  %v633_v45 = vmov 1966171168   ;;  %v475_v49 = vshrl.u32 %v474_v47, 7 }
  0x20   : > { %557 = vmatprep.subr.msk.mxu0 %vm277_vm0, %v255_v8  ;;  %v256_v12 = vld [vmem:[%s742_s1] sm:$0xff]  ;;  %v472_v46 = vunpack.c.l.s4 %v633_v45  ;;  %s751_s27 = smov (!%p248_p8, %s556_s27), 3  ;;  %vm488_vm6 = vcmp.lt.s32.totalorder %v474_v47, 256 }
  0x21   : > { %558 = vmatpush1.msk.msra.mxu0 %vm277_vm0, %v254_v9  ;;  %v385_v43 = vld [vmem:[%s744_s3] sm:$0x1]  ;;  %s250_s30 = scalar_lea.vmem %s746_s5, %s751_s27 }
  0x22   : > { %314 = vmatprep.subr.mxu0 %v253_v10  ;;  %v473_v48 = vunpack.c.0.s8 %v472_v46 }
  0x23   : > { %262 = vperm.xlu0 %598, %v258_v7   ;;  %315 = vmatpush1.msra.mxu0 %v252_v11 }
  0x24   : > { %559 = vmatmul.mubr.msk.f32.vlgmr.msra.gmra.mxu0 %vm270_vm1, %v256_v12  ;;  %v476_v55 = vsub.s32 %v473_v48, %v475_v49 }
  0x25   : > { %354 = vmatprep.mubr.f32.mxu0 %v631_v4 }
  0x28   : > { %560 = vmatmul.mubr.msk.f32.gmra.mxu0 %vm270_vm1, %v257_v13 }
  0x9a   : > { %v268_v14 = vpop.permute.xlu0 %267 }
  0x9e   : > { %v263_v15 = vpop.permute.xlu0 %262 }
  0xe4   : > { %v350_v16 = vpop.f32.mrf.mxu0 }
  0xe5   : > { %v351_v17 = vadd.f32 %v350_v16, %v263_v15 }
  0xe6   : > { %v352_v18 = vpop.f32.mrf.mxu0 }
  0xe7   : > { %v353_v19 = vadd.f32 %v352_v18, %v263_v15  ;;  %v365_v20 = vmin.f32 %v351_v17, 0.0  ;;  %vm361_vm5 = vcmp.gt.f32.partialorder %v351_v17, 0.0 }
  0xe8   : > { %v356_v21 = vpop.f32.mrf.mxu0 }
  0xe9   : > { %v366_v22 = vmin.f32 %v353_v19, 0.0  ;;  %v357_v23 = vadd.f32 %v356_v21, %v268_v14  ;;  %v369_v28 = vmul.f32 1.442695, %v365_v20  ;;  %vm362_vm4 = vcmp.gt.f32.partialorder %v353_v19, 0.0 }
  0xea   : > { %v358_v24 = vpop.f32.mrf.mxu0 }
  0xeb   : > { %v371_v25 = vmul.f32 1.442695, %v366_v22  ;;  %v367_v26 = vmin.f32 %v357_v23, 0.0  ;;  %v359_v27 = vadd.f32 %v358_v24, %v268_v14  ;;  %vm363_vm3 = vcmp.gt.f32.partialorder %v357_v23, 0.0 }
  0xed   : > { %v373_v29 = vmul.f32 1.442695, %v367_v26  ;;  %v368_v30 = vmin.f32 %v359_v27, 0.0  ;;  %599 = vpow2.f32 %v371_v25  ;;  %vm364_vm2 = vcmp.gt.f32.partialorder %v359_v27, 0.0 }
  0xef   : > { %601 = vpow2.f32 %v373_v29  ;;  %v375_v31 = vmul.f32 1.442695, %v368_v30 }
  0xf0   : > { %603 = vpow2.f32 %v369_v28 }
  0xf1   : > { %605 = vpow2.f32 %v375_v31 }
  0xfa   : > { %v600_v32 = vpop.eup %599 }
  0xfb   : > { %v562_v38 = vadd.f32 -1.0, %v600_v32 }
  0xfc   : > { %v602_v33 = vpop.eup %601 }
  0xfd   : > { %v604_v34 = vpop.eup %603  ;;  %v563_v36 = vadd.f32 -1.0, %v602_v33  ;;  %v382_v42 = vsel %vm362_vm4, %v353_v19, %v562_v38 }
  0xfe   : > { %v606_v35 = vpop.eup %605  ;;  %v561_v39 = vadd.f32 -1.0, %v604_v34 }
  0xff   : > { %v564_v37 = vadd.f32 -1.0, %v606_v35  ;;  %v383_v41 = vsel %vm363_vm3, %v357_v23, %v563_v36 }
 0x100   : > { %v381_v44 = vsel %vm361_vm5, %v351_v17, %v561_v39 }
 0x101   : > { %v384_v40 = vsel %vm364_vm2, %v359_v27, %v564_v37 }
 0x102   : > { %565 = vmatprep.subr.msk.mxu1 %vm277_vm0, %v384_v40 }
 0x103   : > { %566 = vmatpush1.msk.msra.mxu1 %vm277_vm0, %v383_v41 }
 0x104   : > { %427 = vmatprep.subr.mxu1 %v382_v42 }
 0x105   : > { %428 = vmatpush1.msra.mxu1 %v381_v44 }
 0x106   : > { %567 = vmatmul.mubr.msk.f32.vlgmr.msra.gmra.mxu1 %vm270_vm1, %v385_v43 }
 0x1c6   : > { %v463_v51 = vpop.f32.mrf.mxu1 }
 0x1c7   : > { %v464_v53 = vadd.f32 %v463_v51, %v387_v50 }
 0x1c8   : > { %v465_v52 = vpop.f32.mrf.mxu1 }
 0x1c9   : > { %v466_v54 = vadd.f32 %v465_v52, %v387_v50 }
 0x1cb   : > { %v470_v56 = vcombine.low %v464_v53, %v466_v54 }
 0x1cd   : > { %v477_v57 = vrot.slane %v470_v56, %v476_v55 }
 0x1cf   : > { %v484_v58 = vrot.slane %v477_v57, %v476_v55 }
 0x1d1   : > { %490 = vst.msk [vmem:[%s250_s30] sm:$0x3] %vm488_vm6, %v484_v58 }
 0x1d2 PF: > { %p13_p9 = scmp.ge.s32.totalorder %s684_s23, 4   ;;  %s747_s20 = smov %s625_s21 }
 0x1d3   : > { %s748_s21 = smov %s693_s26  ;;  %s749_s22 = smov %s684_s23 }
 0x1d4   :  { %15 = sbr.rel (!%p13_p9) target bundleno = 4 (0x4), region = 98 }

</bundles_post_ra>
